<compile_context>
chip_gen: v7x
topology: tpu7x:2x2x1
jax: 0.10.0
libtpu: 0.0.40
codegen_flags: <defaults>
</compile_context>

<pallas_src>
import functools

import jax
import jax.numpy as jnp
from jax import lax
from jax.experimental import pallas as pl
from jax.experimental.pallas import tpu as pltpu


def _round_up(x: int, m: int) -> int:
    return (x + m - 1) // m * m


def _pmf_fwd_kernel(uid_ref, iid_ref, u_tbl_ref, i_tbl_ref, o_ref, prod_ref, *,
                    tile_b: int):
    """One batch tile: gather rows from VMEM-resident tables, multiply, reduce.

    uid_ref / iid_ref : SMEM int32 (B_pad,)      -- scalar-prefetched ids
    u_tbl_ref         : VMEM (n_user, K)         -- full user embedding table
    i_tbl_ref         : VMEM (n_item, K)         -- full item embedding table
    o_ref             : VMEM (tile_b, 1) f32     -- per-sample dot products
    prod_ref          : VMEM (tile_b, K) f32     -- scratch for gathered products
    """
    t = pl.program_id(0)
    base = t * tile_b

    def gather_one(b, carry):
        uid = uid_ref[base + b]                                   # SMEM scalar
        iid = iid_ref[base + b]
        u_row = u_tbl_ref[pl.ds(uid, 1), :].astype(jnp.float32)   # (1, K)
        i_row = i_tbl_ref[pl.ds(iid, 1), :].astype(jnp.float32)   # (1, K)
        prod_ref[pl.ds(b, 1), :] = u_row * i_row                  # f32 product
        return carry

    lax.fori_loop(0, tile_b, gather_one, None)

    # Reduce latent dim (lanes) -> (tile_b, 1), accumulate in f32.
    o_ref[...] = jnp.sum(prod_ref[...], axis=1, keepdims=True)


def logistic_pmf_forward(user_emb_w, item_emb_w, user_idx, item_idx, *,
                         tile_b: int = 256):
    """LogisticPMF.forward: scores[b] = <U[user_idx[b]], V[item_idx[b]]>."""
    n_user, k_dim = user_emb_w.shape
    n_item, k_dim_i = item_emb_w.shape
    assert k_dim == k_dim_i, "user/item embeddings must share k_dim"
    b = int(user_idx.shape[0])

    # Batch tile: multiple of 8 (sublane rule for the (tile_b, 1) output block),
    # no larger than the padded batch.
    tile_b = max(8, min(_round_up(tile_b, 8), _round_up(b, 8)))
    b_pad = _round_up(b, tile_b)
    num_tiles = b_pad // tile_b

    # Pad ids with 0 (a valid row); padded outputs are dropped below.
    uid = jnp.pad(user_idx.astype(jnp.int32), (0, b_pad - b))
    iid = jnp.pad(item_idx.astype(jnp.int32), (0, b_pad - b))

    kernel = functools.partial(_pmf_fwd_kernel, tile_b=tile_b)

    out = pl.pallas_call(
        kernel,
        out_shape=jax.ShapeDtypeStruct((b_pad, 1), jnp.float32),
        grid_spec=pltpu.PrefetchScalarGridSpec(
            num_scalar_prefetch=2,          # uid, iid -> SMEM
            grid=(num_tiles,),
            in_specs=[
                # Full tables resident in VMEM: same block index every step
                # -> DMA'd from HBM exactly once.
                pl.BlockSpec((n_user, k_dim), lambda t, u_ids, i_ids: (0, 0)),
                pl.BlockSpec((n_item, k_dim), lambda t, u_ids, i_ids: (0, 0)),
            ],
            out_specs=pl.BlockSpec((tile_b, 1), lambda t, u_ids, i_ids: (t, 0)),
            scratch_shapes=[pltpu.VMEM((tile_b, k_dim), jnp.float32)],
        ),
        compiler_params=pltpu.CompilerParams(
            dimension_semantics=("parallel",),       # shard tiles across TCs (v7x)
            vmem_limit_bytes=32 * 1024 * 1024,       # > v5e's 16 MiB default scope
        ),
    )(uid, iid, user_emb_w, item_emb_w)

    return out[:b, 0]                                # (B,), matches torch .sum(1)


if __name__ == "__main__":
    # Deterministic parameter init mirroring LogisticPMF.__init__:
    #   nn.Embedding(n_user, k_dim), nn.Embedding(n_item, k_dim)
    #   nn.init.normal_(weight, mean=0, std=std_user / std_item)
    n_user, n_item, k_dim = 64, 128, 32
    std_user, std_item = 1.0, 1.0
    batch = 20            # deliberately not a multiple of the tile -> tests padding

    key = jax.random.PRNGKey(0)
    k_u, k_i, k_uid, k_iid = jax.random.split(key, 4)

    embedding_user = std_user * jax.random.normal(k_u, (n_user, k_dim), jnp.float32)
    embedding_item = std_item * jax.random.normal(k_i, (n_item, k_dim), jnp.float32)

    user_idx = jax.random.randint(k_uid, (batch,), 0, n_user, dtype=jnp.int32)
    item_idx = jax.random.randint(k_iid, (batch,), 0, n_item, dtype=jnp.int32)

    # Small tile so the run exercises a multi-step grid (3 tiles) + tail padding.
    scores = logistic_pmf_forward(embedding_user, embedding_item,
                                  user_idx, item_idx, tile_b=8)
    scores = jax.block_until_ready(scores)

    # Pure-JAX reference of the forward semantics.
    ref = jnp.sum(embedding_user[user_idx] * embedding_item[item_idx], axis=1)
    assert scores.shape == (batch,)
    assert jnp.allclose(scores, ref, atol=1e-5, rtol=1e-5), (scores, ref)

    print("KERNEL_OK")
</pallas_src>

<mosaic_0001>
module attributes {stable_mosaic.version = 11 : i64} {
  func.func @_pmf_fwd_kernel(%arg0: i32, %arg1: memref<24xi32, #tpu.memory_space<smem>>, %arg2: memref<24xi32, #tpu.memory_space<smem>>, %arg3: memref<64x32xf32, #tpu.memory_space<vmem>>, %arg4: memref<128x32xf32, #tpu.memory_space<vmem>>, %arg5: memref<8x1xf32, #tpu.memory_space<vmem>>, %arg6: memref<8x32xf32, #tpu.memory_space<vmem>>) attributes {dimension_semantics = [#tpu.dimension_semantics<parallel>], iteration_bounds = array<i64: 3>, scalar_prefetch = 2 : i64, scratch_operands = 1 : i64, tpu.core_type = #tpu.core_type<tc>, window_params = [{pipeline_mode = #tpu.pipeline_mode<synchronous>, transform_indices = @transform_0, window_bounds = array<i64: 64, 32>}, {pipeline_mode = #tpu.pipeline_mode<synchronous>, transform_indices = @transform_1, window_bounds = array<i64: 128, 32>}, {transform_indices = @transform_2, window_bounds = array<i64: 8, 1>}]} {
    %c8_i32 = arith.constant 8 : i32
    %0 = arith.muli %arg0, %c8_i32 : i32
    %c0_i32 = arith.constant 0 : i32
    %c8_i32_0 = arith.constant 8 : i32
    %1 = arith.addi %c0_i32, %c8_i32_0 : i32
    %c1_i32 = arith.constant 1 : i32
    scf.for %arg7 = %c0_i32 to %1 step %c1_i32  : i32 {
      %6 = arith.addi %0, %arg7 : i32
      %7 = arith.index_cast %6 : i32 to index
      %8 = memref.load %arg1[%7] : memref<24xi32, #tpu.memory_space<smem>>
      %9 = arith.addi %0, %arg7 : i32
      %10 = arith.index_cast %9 : i32 to index
      %11 = memref.load %arg2[%10] : memref<24xi32, #tpu.memory_space<smem>>
      %12 = arith.index_cast %8 : i32 to index
      %c0_5 = arith.constant 0 : index
      %13 = vector.load %arg3[%12, %c0_5] : memref<64x32xf32, #tpu.memory_space<vmem>>, vector<1x32xf32>
      %14 = arith.index_cast %11 : i32 to index
      %c0_6 = arith.constant 0 : index
      %15 = vector.load %arg4[%14, %c0_6] : memref<128x32xf32, #tpu.memory_space<vmem>>, vector<1x32xf32>
      %16 = arith.mulf %13, %15 : vector<1x32xf32>
      %17 = arith.index_cast %arg7 : i32 to index
      %c0_7 = arith.constant 0 : index
      %18 = vector.load %arg6[%17, %c0_7] : memref<8x32xf32, #tpu.memory_space<vmem>>, vector<1x32xf32>
      tpu.vector_store %arg6[%17, %c0_7], %16 {strides = array<i32>} : memref<8x32xf32, #tpu.memory_space<vmem>>, vector<1x32xf32>,
    }
    %c8_i32_1 = arith.constant 8 : i32
    %c0 = arith.constant 0 : index
    %c0_2 = arith.constant 0 : index
    %2 = vector.load %arg6[%c0, %c0_2] : memref<8x32xf32, #tpu.memory_space<vmem>>, vector<8x32xf32>
    %cst = arith.constant dense<0.000000e+00> : vector<8xf32>
    %3 = vector.multi_reduction <add>, %2, %cst [1] : vector<8x32xf32> to vector<8xf32>
    %4 = vector.shape_cast %3 : vector<8xf32> to vector<8x1xf32>
    %c0_3 = arith.constant 0 : index
    %c0_4 = arith.constant 0 : index
    %5 = vector.load %arg5[%c0_3, %c0_4] : memref<8x1xf32, #tpu.memory_space<vmem>>, vector<8x1xf32>
    tpu.vector_store %arg5[%c0_3, %c0_4], %4 {strides = array<i32>} : memref<8x1xf32, #tpu.memory_space<vmem>>, vector<8x1xf32>,
    return
  }
  func.func @transform_0(%arg0: i32, %arg1: memref<24xi32, #tpu.memory_space<smem>>, %arg2: memref<24xi32, #tpu.memory_space<smem>>) -> (i32, i32) {
    %c0_i32 = arith.constant 0 : i32
    %c0_i32_0 = arith.constant 0 : i32
    %c0_i32_1 = arith.constant 0 : i32
    return %c0_i32, %c0_i32_0 : i32, i32
  }
  func.func @transform_1(%arg0: i32, %arg1: memref<24xi32, #tpu.memory_space<smem>>, %arg2: memref<24xi32, #tpu.memory_space<smem>>) -> (i32, i32) {
    %c0_i32 = arith.constant 0 : i32
    %c0_i32_0 = arith.constant 0 : i32
    %c0_i32_1 = arith.constant 0 : i32
    return %c0_i32, %c0_i32_0 : i32, i32
  }
  func.func @transform_2(%arg0: i32, %arg1: memref<24xi32, #tpu.memory_space<smem>>, %arg2: memref<24xi32, #tpu.memory_space<smem>>) -> (i32, i32) {
    %c0_i32 = arith.constant 0 : i32
    %c0_i32_0 = arith.constant 0 : i32
    return %arg0, %c0_i32 : i32, i32
  }
}

</mosaic_0001>

<bundles_post_ra>
// kernel: tpu_custom_call.1
= control target key start
LH: loop header
LB: loop body
LE: loop exit
PB: predicated region body
PF: predicated region fallthrough
CT: control target
= control target key end

     0   :  { %s329_s0 = inlined_call_operand.vmem [shape: s32[24], index: 0, kind: input, shape index: {}]   ;;  %s330_s2 = inlined_call_operand.vmem [shape: f32[64,32], index: 2, kind: input, shape index: {}]   ;;  %s331_s3 = inlined_call_operand.vmem [shape: f32[128,32], index: 3, kind: input, shape index: {}]   ;;  %s332_s4 = inlined_call_operand.vmem [shape: f32[24,1], index: 4, kind: output, shape index: {}]   ;;  %s333_s1 = inlined_call_operand.vmem [shape: s32[24], index: 1, kind: input, shape index: {}]  }
   0x1   :  { %s9_s17 = sshll.u32 %s329_s0, 4  ;;  %s13_s20 = sshll.u32 %s333_s1, 4  ;;  %s10_s17 = int_to_ptr.vmem [resolvable:$true] %s9_s17  ;;  %s14_s20 = int_to_ptr.vmem [resolvable:$true] %s13_s20 }
   0x2   :  { %s234_s21 = scalar_lea.vmem %s10_s17, 16  ;;  %p239_p1 = scmp.lt.s32.totalorder %s10_s17, %s10_s17 }
   0x3   :  { %p235_p0 = scmp.ne.s32.totalorder %s10_s17, %s234_s21  ;;  %p240_p2 = scmp.lt.s32.totalorder %s234_s21, %s234_s21 }
   0x5   :  { %p241_p3 = por %p240_p2, %p239_p1 }
   0x7   :  { %p242_p4 = pnand %p241_p3, %p235_p0 }
   0x9   :  { %245 = shalt.err (!%p242_p4)  }
   0xa   :  { %s276_s22 = smov [#allocation4]   ;;  %s246_s23 = scalar_lea.vmem %s14_s20, 16 }
   0xb   :  { %12 = dma.vmem_to_smem %s10_s17, 16, %s276_s22, [#allocation3] }
   0xc   :  { %p247_p5 = scmp.ne.s32.totalorder %s14_s20, %s246_s23  ;;  %p251_p6 = scmp.lt.s32.totalorder %s14_s20, %s14_s20 }
   0xd   :  { %p252_p7 = scmp.lt.s32.totalorder %s246_s23, %s246_s23 }
   0xf   :  { %p253_p8 = por %p252_p7, %p251_p6 }
  0x11   :  { %p254_p9 = pnand %p253_p8, %p247_p5 }
  0x13   :  { %257 = shalt.err (!%p254_p9)  }
  0x14   :  { %s277_s0 = smov [#allocation5]  }
  0x15   :  { %16 = dma.vmem_to_smem %s14_s20, 16, %s277_s0, [#allocation3] }
  0x16   :  { %266 = dma.done.wait [#allocation3], 32 }
  0x17   :  { %267 = vsyncadd [#allocation3], 4294967264 }
  0x18   :  { %18 = sfence }
  0x19   :  { %s309_s1 = smov 0  }
  0x1a LB: > { %s208_s24 = sadd.s32 4294967295, %s270_s1   ;;  %p211_p10 = scmp.ge.s32.totalorder %s270_s1, 1  ;;  %s270_s1 = sphi %s309_s1, %s24_s1  }
  0x1b   : > { %p114_p11 = scmp.lt.s32.totalorder %s270_s1, 4 }
  0x1d   : > { %p115_p12 = pnand %p211_p10, %p114_p11 }
  0x1e   : > { %p130_p13 = scmp.lt.s32.totalorder (!%p115_p12), %s208_s24, 2  ;;  %s213_s25 = sshll.u32 (!%p115_p12), %s208_s24, 3 }
  0x1f   : > { %118 = sbr.rel (%p115_p12) target bundleno = 205 (0xcd), region = 28  ;;  %s272_s30 = smov (!%p115_p12), 0  }
  0x26   : > { %s335_s24 = smov (!%p130_p13, %s208_s24), 2 }
  0x27   : > { %s212_s26 = sshll.u32 %s335_s24, 3 }
  0x28   : > { %s133_s29 = scalar_lea.vmem %s332_s4, %s212_s26 }
  0x29 LB: >> { %s141_s5 = sadd.s32 %s274_s30, %s213_s25  ;;  %vm150_vm0 = vcmask 253952   ;;  %s149_s14 = scalar_lea.vmem [#allocation2], %s274_s30  ;;  %s274_s30 = sphi %s272_s30, %s140_s30  }
  0x2a   : >> { %s142_s6 = sld [smem:[#allocation4 + %s141_s5]]  ;;  %s140_s30 = sadd.s32 1, %s274_s30  }
  0x2b   : >> { %s143_s7 = sld [smem:[#allocation5 + %s141_s5]]  ;;  %p137_p0 = scmp.ge.s32.totalorder %s140_s30, 8  }
  0x2c   : > { %vm153_vm1 = vcmask (%p137_p0), 261120   ;;  %vm157_vm2 = vcmask (%p137_p0), 7168  }
  0x2f   : > { %139 = sbr.rel (!%p137_p0) target bundleno = 41 (0x29), region = 65 }
  0x30   : >> { %s144_s10 = scalar_lea.vmem %s330_s2, %s142_s6 }
  0x31   : >> { %s146_s13 = scalar_lea.vmem %s331_s3, %s143_s7  ;;  %v145_v0 = vld [vmem:[%s144_s10] sm:$0x1] }
  0x32   : >> { %v147_v1 = vld [vmem:[%s146_s13] sm:$0x1] }
  0x33   : >> { %v148_v2 = vmul.f32 %v147_v1, %v145_v0 }
  0x35   : >> { %151 = vst.msk [vmem:[%s149_s14] sm:$0x1] %vm150_vm0, %v148_v2 }
  0x3c   : > { %v152_v3 = vld [vmem:[#allocation2] sm:$0xff] }
  0x3d   : > { %v154_v4 = vsel %vm153_vm1, %v152_v3, 0.0 }
  0x3e   : > { %155 = vadd.xlane.f32.xlu0 %v154_v4 }
  0xcb   : > { %v156_v5 = vpop.xlane.xlu0 %155 }
  0xcc   : > { %158 = vst.msk [vmem:[%s133_s29] sm:$0xff] %vm157_vm2, %v156_v5 }
  0xcd PF: > { %s24_s1 = sadd.s32 1, %s270_s1  }
  0xce   : > { %p21_p1 = scmp.ge.s32.totalorder %s24_s1, 5  }
  0xd0   :  { %23 = sbr.rel (!%p21_p1) target bundleno = 26 (0x1a), region = 76 }

</bundles_post_ra>
